<compile_context>
chip_gen: v7x
topology: tpu7x:2x2x1
jax: 0.10.0
libtpu: 0.0.40
codegen_flags: <defaults>
</compile_context>

<pallas_src>
import functools

import jax
import jax.numpy as jnp
from jax.experimental import pallas as pl
from jax.experimental.pallas import tpu as pltpu


def _round_up(x, m):
    return ((x + m - 1) // m) * m


# ----------------------------------------------------------------------------
# Fused kernel: logits = x @ w_packed ; out = log_softmax over the valid classes.
# w_packed's padded class columns are all-zero; mask_ref holds 0 for valid
# classes and -inf for padded ones, so the max/sum only see real classes.
# ----------------------------------------------------------------------------
def _linear_logsoftmax_kernel(x_ref, w_ref, mask_ref, o_ref, *, out_dim):
    logits = jnp.dot(x_ref[...], w_ref[...],
                     preferred_element_type=jnp.float32)      # (tm, Np) f32
    masked = logits + mask_ref[...]                           # (1, Np) additive mask
    m = jnp.max(masked, axis=-1, keepdims=True)
    s = jnp.sum(jnp.exp(masked - m), axis=-1, keepdims=True)
    lse = m + jnp.log(s)
    o_ref[...] = (logits[:, :out_dim] - lse).astype(o_ref.dtype)  # unpadded store


# ----------------------------------------------------------------------------
# One-time weight preprocessing (static; NOT per forward call).
# ----------------------------------------------------------------------------
def prepare_params(w, max_unit):
    """w: (output_dim, max_unit) PyTorch nn.Linear layout, float32."""
    out_dim, k = w.shape
    assert k == max_unit, (k, max_unit)
    kp = _round_up(max_unit, 128)
    np_ = _round_up(out_dim, 128)
    w_packed = (jnp.zeros((kp, np_), jnp.float32)
                .at[:max_unit, :out_dim].set(w.T.astype(jnp.float32)))
    mask = jnp.where(jnp.arange(np_) < out_dim, 0.0, -jnp.inf)
    mask = mask.astype(jnp.float32).reshape(1, np_)
    return {"w_packed": w_packed, "mask": mask}


# ----------------------------------------------------------------------------
# Forward wrapper: tiling + pallas_call (no activation copies in the common case)
# ----------------------------------------------------------------------------
def pattern_classifier_forward(x, w_packed, mask, *, out_dim):
    B, input_dim = x.shape
    kp, np_ = w_packed.shape

    # Batch tiling: near-equal 8-aligned tiles; >=2 tiles when B > 8 (v7x
    # megacore), <=1024 rows per tile (amortize ~0.35us/step on v5e/v6e).
    mp8 = _round_up(B, 8)
    n_tiles = 1 if mp8 <= 8 else max(2, pl.cdiv(mp8, 1024))
    tm = _round_up(pl.cdiv(mp8, n_tiles), 8)
    mp = tm * n_tiles

    # Feed x directly whenever possible: the BlockSpec reads only the first kp
    # columns; columns in [max_unit, kp) meet zero weight rows (no contribution).
    if mp == B and input_dim >= kp:
        x_in = x
    else:
        c = min(input_dim, kp)
        x_in = jnp.zeros((mp, kp), x.dtype).at[:B, :c].set(x[:, :c])

    out = pl.pallas_call(
        functools.partial(_linear_logsoftmax_kernel, out_dim=out_dim),
        out_shape=jax.ShapeDtypeStruct((mp, out_dim), jnp.float32),
        grid_spec=pltpu.PrefetchScalarGridSpec(
            num_scalar_prefetch=0,
            grid=(n_tiles,),
            in_specs=[
                pl.BlockSpec((tm, kp), lambda i: (i, 0)),    # batch tile, pipelined
                pl.BlockSpec((kp, np_), lambda i: (0, 0)),   # weights VMEM-resident
                pl.BlockSpec((1, np_), lambda i: (0, 0)),    # class mask, resident
            ],
            out_specs=pl.BlockSpec((tm, out_dim), lambda i: (i, 0)),
        ),
        compiler_params=pltpu.CompilerParams(
            dimension_semantics=("parallel",),               # megacore on v7x
            vmem_limit_bytes=32 * 1024 * 1024,
        ),
    )(x_in, w_packed, mask)

    return out if mp == B else out[:B]


@functools.partial(jax.jit, static_argnames=("out_dim",))
def pattern_classifier_apply(x, w_packed, mask, *, out_dim):
    return pattern_classifier_forward(x, w_packed, mask, out_dim=out_dim)


# TODO(synk): BaseNet forward-hook / tensor_log pattern capture is host-side
# bookkeeping, not part of the forward math; not translated.

if __name__ == "__main__":
    INPUT_DIM, MAX_UNIT, OUTPUT_DIM, BATCH = 512, 384, 10, 8

    key = jax.random.PRNGKey(0)
    wkey, xkey = jax.random.split(key)
    bound = 1.0 / float(MAX_UNIT) ** 0.5
    w = jax.random.uniform(wkey, (OUTPUT_DIM, MAX_UNIT), jnp.float32, -bound, bound)
    # PatternClassifier consumes binary activation-pattern vectors.
    x = jax.random.bernoulli(xkey, 0.5, (BATCH, INPUT_DIM)).astype(jnp.float32)

    packed = prepare_params(w, MAX_UNIT)   # one-time weight slab + class mask

    out = pattern_classifier_apply(x, packed["w_packed"], packed["mask"],
                                   out_dim=OUTPUT_DIM)
    out = jax.block_until_ready(out)

    assert out.shape == (BATCH, OUTPUT_DIM), out.shape
    assert out.dtype == jnp.float32
    assert bool(jnp.all(jnp.isfinite(out)))
    # Check against a pure-JAX reference of the PyTorch forward.
    ref = jax.nn.log_softmax(x[:, :MAX_UNIT] @ w.T, axis=1)
    assert bool(jnp.allclose(out, ref, atol=1e-4, rtol=1e-4)), \
        float(jnp.max(jnp.abs(out - ref)))
    # log_softmax self-consistency: each row of exp(out) sums to 1.
    row_sums = jnp.sum(jnp.exp(out), axis=1)
    assert bool(jnp.allclose(row_sums, 1.0, atol=1e-3)), row_sums
    print("KERNEL_OK")
</pallas_src>

<mosaic_0001>
module attributes {stable_mosaic.version = 11 : i64} {
  func.func @_linear_logsoftmax_kernel(%arg0: i32, %arg1: memref<8x384xf32, #tpu.memory_space<vmem>>, %arg2: memref<384x128xf32, #tpu.memory_space<vmem>>, %arg3: memref<1x128xf32, #tpu.memory_space<vmem>>, %arg4: memref<8x10xf32, #tpu.memory_space<vmem>>) attributes {dimension_semantics = [#tpu.dimension_semantics<parallel>], iteration_bounds = array<i64: 1>, scalar_prefetch = 0 : i64, scratch_operands = 0 : i64, tpu.core_type = #tpu.core_type<tc>, window_params = [{transform_indices = @transform_0, window_bounds = array<i64: 8, 384>}, {pipeline_mode = #tpu.pipeline_mode<synchronous>, transform_indices = @transform_1, window_bounds = array<i64: 384, 128>}, {pipeline_mode = #tpu.pipeline_mode<synchronous>, transform_indices = @transform_2, window_bounds = array<i64: 1, 128>}, {transform_indices = @transform_3, window_bounds = array<i64: 8, 10>}]} {
    %c0 = arith.constant 0 : index
    %c0_0 = arith.constant 0 : index
    %0 = vector.load %arg1[%c0, %c0_0] : memref<8x384xf32, #tpu.memory_space<vmem>>, vector<8x384xf32>
    %c0_1 = arith.constant 0 : index
    %c0_2 = arith.constant 0 : index
    %1 = vector.load %arg2[%c0_1, %c0_2] : memref<384x128xf32, #tpu.memory_space<vmem>>, vector<384x128xf32>
    %cst = arith.constant dense<0.000000e+00> : vector<8x128xf32>
    %2 = tpu.matmul %0, %1, %cst {dimension_numbers = #tpu.dot_dimension_numbers<[1], [0], [0], [1], [0, 0, 1, 1], [], []>} : vector<8x384xf32>, vector<384x128xf32>, vector<8x128xf32> -> vector<8x128xf32>
    %c0_3 = arith.constant 0 : index
    %c0_4 = arith.constant 0 : index
    %3 = vector.load %arg3[%c0_3, %c0_4] : memref<1x128xf32, #tpu.memory_space<vmem>>, vector<1x128xf32>
    %4 = vector.broadcast %3 : vector<1x128xf32> to vector<8x128xf32>
    %5 = arith.addf %2, %4 : vector<8x128xf32>
    %cst_5 = arith.constant dense<0xFF800000> : vector<8xf32>
    %6 = vector.multi_reduction <maximumf>, %5, %cst_5 [1] : vector<8x128xf32> to vector<8xf32>
    %7 = vector.shape_cast %6 : vector<8xf32> to vector<8x1xf32>
    %8 = vector.broadcast %7 : vector<8x1xf32> to vector<8x128xf32>
    %9 = arith.subf %5, %8 : vector<8x128xf32>
    %10 = math.exp %9 : vector<8x128xf32>
    %cst_6 = arith.constant dense<0.000000e+00> : vector<8xf32>
    %11 = vector.multi_reduction <add>, %10, %cst_6 [1] : vector<8x128xf32> to vector<8xf32>
    %12 = vector.shape_cast %11 : vector<8xf32> to vector<8x1xf32>
    %13 = math.log %12 : vector<8x1xf32>
    %14 = arith.addf %7, %13 : vector<8x1xf32>
    %15 = vector.extract_strided_slice %2 {offsets = [0, 0], sizes = [8, 10], strides = [1, 1]} : vector<8x128xf32> to vector<8x10xf32>
    %16 = vector.broadcast %14 : vector<8x1xf32> to vector<8x10xf32>
    %17 = arith.subf %15, %16 : vector<8x10xf32>
    %c0_7 = arith.constant 0 : index
    %c0_8 = arith.constant 0 : index
    %18 = vector.load %arg4[%c0_7, %c0_8] : memref<8x10xf32, #tpu.memory_space<vmem>>, vector<8x10xf32>
    tpu.vector_store %arg4[%c0_7, %c0_8], %17 {strides = array<i32>} : memref<8x10xf32, #tpu.memory_space<vmem>>, vector<8x10xf32>,
    return
  }
  func.func @transform_0(%arg0: i32) -> (i32, i32) {
    %c0_i32 = arith.constant 0 : i32
    %c0_i32_0 = arith.constant 0 : i32
    return %arg0, %c0_i32 : i32, i32
  }
  func.func @transform_1(%arg0: i32) -> (i32, i32) {
    %c0_i32 = arith.constant 0 : i32
    %c0_i32_0 = arith.constant 0 : i32
    %c0_i32_1 = arith.constant 0 : i32
    return %c0_i32, %c0_i32_0 : i32, i32
  }
  func.func @transform_2(%arg0: i32) -> (i32, i32) {
    %c0_i32 = arith.constant 0 : i32
    %c0_i32_0 = arith.constant 0 : i32
    %c0_i32_1 = arith.constant 0 : i32
    return %c0_i32, %c0_i32_0 : i32, i32
  }
  func.func @transform_3(%arg0: i32) -> (i32, i32) {
    %c0_i32 = arith.constant 0 : i32
    %c0_i32_0 = arith.constant 0 : i32
    return %arg0, %c0_i32 : i32, i32
  }
}

</mosaic_0001>

<bundles_post_ra>
// kernel: pattern_classifier_apply.1
= control target key start
LH: loop header
LB: loop body
LE: loop exit
PB: predicated region body
PF: predicated region fallthrough
CT: control target
= control target key end

     0   :  { %8 = vsyncpa [#allocation3], 0  ;;  %s582_s0 = inlined_call_operand.hbm [shape: f32[8,512], index: 0, kind: input, shape index: {}]   ;;  %s583_s1 = inlined_call_operand.hbm [shape: f32[384,128], index: 1, kind: input, shape index: {}]   ;;  %s584_s2 = inlined_call_operand.vmem [shape: f32[1,128], index: 2, kind: input, shape index: {}]   ;;  %s585_s3 = inlined_call_operand.hbm [shape: f32[8,10], index: 3, kind: output, shape index: {}]  }
   0x1   :  { %9 = vsyncpa [#allocation6], 0 }
   0x2   :  { %10 = vsyncpa [#allocation4], 0  ;;  %s497_s12 = smov [#allocation2]   ;;  %s498_s14 = smov [#allocation5]  }
   0x3   :  { %s17_s13 = sshll.u32 %s497_s12, 4  ;;  %s26_s15 = sshll.u32 %s498_s14, 4  ;;  %s18_s13 = int_to_ptr.vmem [resolvable:$true] %s17_s13  ;;  %s525_s15 = int_to_ptr.vmem [resolvable:$true] %s26_s15 }
   0x4   :  { %s425_s18 = scalar_lea.hbm %s582_s0, 384  ;;  %s427_s23 = scalar_lea.hbm %s582_s0, 512 }
   0x5   :  { %p426_p0 = scmp.ne.s32.totalorder %s582_s0, %s425_s18  ;;  %p428_p1 = scmp.lt.u32.totalorder %s427_s23, %s425_s18 }
   0x6   :  { %p429_p2 = scmp.lt.u32.totalorder %s425_s18, %s582_s0 }
   0x8   :  { %p430_p3 = por %p429_p2, %p428_p1 }
   0xa   :  { %p431_p4 = pnand %p430_p3, %p426_p0 }
   0xc   :  { %434 = shalt.err (!%p431_p4)
}
   0xd   :  { %s435_s26 = scalar_lea.vmem %s18_s13, 384  ;;  %p440_p6 = scmp.lt.s32.totalorder %s18_s13, %s18_s13 }
   0xe   :  { %p436_p5 = scmp.ne.s32.totalorder %s18_s13, %s435_s26  ;;  %p441_p7 = scmp.lt.s32.totalorder %s435_s26, %s435_s26 }
  0x10   :  { %p442_p8 = por %p441_p7, %p440_p6 }
  0x12   :  { %p443_p9 = pnand %p442_p8, %p436_p5 }
  0x14   :  { %446 = shalt.err (!%p443_p9)
}
  0x15   :  { %20 = dma.hbm_to_vmem [thread:$0]  %s582_s0, 384, %s18_s13, [#allocation3]  }
  0x16   :  { %s447_s4 = scalar_lea.hbm %s583_s1, 6144 }
  0x17   :  { %p448_p10 = scmp.ne.s32.totalorder %s583_s1, %s447_s4  ;;  %p451_p11 = scmp.lt.u32.totalorder %s447_s4, %s583_s1 }
  0x19   :  { %p453_p12 = pnand %p451_p11, %p448_p10 }
  0x1b   :  { %456 = shalt.err (!%p453_p12)
}
  0x1c   :  { %s457_s9 = scalar_lea.vmem %s525_s15, 6144  ;;  %p462_p0 = scmp.lt.s32.totalorder %s525_s15, %s525_s15 }
  0x1d   :  { %p458_p13 = scmp.ne.s32.totalorder %s525_s15, %s457_s9  ;;  %p463_p1 = scmp.lt.s32.totalorder %s457_s9, %s457_s9 }
  0x1f   :  { %p464_p2 = por %p463_p1, %p462_p0 }
  0x21   :  { %p465_p3 = pnand %p464_p2, %p458_p13 }
  0x23   :  { %468 = shalt.err (!%p465_p3)
}
  0x24   :  { %s499_s0 = smov 128   ;;  %s500_s10 = smov 8  }
  0x25   :  { %32 = dma.hbm_to_vmem [thread:$0]  %s583_s1, 6144, %s525_s15, [#allocation6], %s499_s0, %s499_s0, %s500_s10  }
  0x26   :  { %491 = dma.done.wait [#allocation3], 384  }
  0x27   :  { %492 = vsyncadd [#allocation3], 4294966912 }
  0x28   :  { %493 = dma.done.wait [#allocation6], 6144  }
  0x29   :  { %494 = vsyncadd [#allocation6], 4294961152  ;;  %v501_v0 = vmov 0.0|0.0   ;;  %vm502_vm0 = vmmov 0   ;;  %v503_v1 = vmov 0.0   ;;  %v60_v2 = vld [vmem:[#allocation5 + $0x80] sm:$0xff] }
  0x2a   :  { %389 = vmatprep.subr.bf16.mxu1 %v501_v0  ;;  %354 = vmatprep.mubr.msk.f32.mxu1 %vm502_vm0, %v503_v1  ;;  %v61_v3 = vld [vmem:[#allocation5 + $0x88] sm:$0xff]  ;;  %v44_v4 = vld [vmem:[#allocation5] sm:$0xff]  ;;  %v62_v11 = vld [vmem:[#allocation5 + $0x90] sm:$0xff]  ;;  %s504_s14 = smov [#allocation7]   ;;  %vm251_vm1 = vcmask 80896  }
  0x2b   :  { %v357_v5 = vpack.c.bf16 %v61_v3, %v60_v2  ;;  %v45_v6 = vld [vmem:[#allocation5 + $0x8] sm:$0xff]  ;;  %v76_v7 = vld [vmem:[#allocation5 + $0x100] sm:$0xff]  ;;  %v63_v12 = vld [vmem:[#allocation5 + $0x98] sm:$0xff]  ;;  %s259_s15 = sshll.u32 %s504_s14, 4  ;;  %s260_s15 = int_to_ptr.vmem [resolvable:$true] %s259_s15 }
  0x2c   :  { %v77_v8 = vld [vmem:[#allocation5 + $0x108] sm:$0xff]  ;;  %v359_v9 = vpack.c.bf16 %v45_v6, %v44_v4  ;;  %v46_v13 = vld [vmem:[#allocation5 + $0x10] sm:$0xff]  ;;  %v361_v14 = vpack.c.bf16 %v63_v12, %v62_v11  ;;  %v47_v15 = vld [vmem:[#allocation5 + $0x18] sm:$0xff]  ;;  %p474_p5 = scmp.lt.s32.totalorder %s260_s15, %s260_s15 }
  0x2d   :  { %v390_v10 = vpack.c.bf16 %v77_v8, %v76_v7  ;;  %358 = vmatprep.subr.bf16.mxu0 %v357_v5  ;;  %v78_v16 = vld [vmem:[#allocation5 + $0x110] sm:$0xff]  ;;  %v79_v17 = vld [vmem:[#allocation5 + $0x118] sm:$0xff]  ;;  %v363_v18 = vpack.c.bf16 %v47_v15, %v46_v13  ;;  %v64_v20 = vld [vmem:[#allocation5 + $0xa0] sm:$0xff] }
  0x2e   :  { %360 = vmatpush3.bf16.msra.mxu0 %v359_v9  ;;  %v393_v19 = vpack.c.bf16 %v79_v17, %v78_v16  ;;  %v65_v21 = vld [vmem:[#allocation5 + $0xa8] sm:$0xff]  ;;  %v48_v22 = vld [vmem:[#allocation5 + $0x20] sm:$0xff]  ;;  %v66_v27 = vld [vmem:[#allocation5 + $0xb0] sm:$0xff] }
  0x2f   :  { %391 = vmatpush3.bf16.msra.mxu1 %v390_v10  ;;  %362 = vmatprep.subr.bf16.mxu0 %v361_v14  ;;  %v365_v23 = vpack.c.bf16 %v65_v21, %v64_v20  ;;  %v49_v24 = vld [vmem:[#allocation5 + $0x28] sm:$0xff]  ;;  %v80_v25 = vld [vmem:[#allocation5 + $0x120] sm:$0xff]  ;;  %v67_v28 = vld [vmem:[#allocation5 + $0xb8] sm:$0xff] }
  0x30   :  { %392 = vmatprep.subr.bf16.mxu1 %v501_v0  ;;  %v81_v26 = vld [vmem:[#allocation5 + $0x128] sm:$0xff]  ;;  %v367_v29 = vpack.c.bf16 %v49_v24, %v48_v22  ;;  %v50_v31 = vld [vmem:[#allocation5 + $0x30] sm:$0xff]  ;;  %v369_v32 = vpack.c.bf16 %v67_v28, %v66_v27  ;;  %v51_v33 = vld [vmem:[#allocation5 + $0x38] sm:$0xff] }
  0x31   :  { %v396_v30 = vpack.c.bf16 %v81_v26, %v80_v25  ;;  %v82_v34 = vld [vmem:[#allocation5 + $0x130] sm:$0xff]  ;;  %v83_v35 = vld [vmem:[#allocation5 + $0x138] sm:$0xff]  ;;  %v68_v36 = vld [vmem:[#allocation5 + $0xc0] sm:$0xff]  ;;  %v371_v38 = vpack.c.bf16 %v51_v33, %v50_v31 }
  0x32   :  { %364 = vmatpush3.bf16.msra.mxu0 %v363_v18  ;;  %v69_v37 = vld [vmem:[#allocation5 + $0xc8] sm:$0xff]  ;;  %v399_v39 = vpack.c.bf16 %v83_v35, %v82_v34  ;;  %v52_v40 = vld [vmem:[#allocation5 + $0x40] sm:$0xff]  ;;  %v70_v45 = vld [vmem:[#allocation5 + $0xd0] sm:$0xff] }
  0x33   :  { %394 = vmatpush3.bf16.msra.mxu1 %v393_v19  ;;  %366 = vmatprep.subr.bf16.mxu0 %v365_v23  ;;  %v373_v41 = vpack.c.bf16 %v69_v37, %v68_v36  ;;  %v53_v42 = vld [vmem:[#allocation5 + $0x48] sm:$0xff]  ;;  %v84_v43 = vld [vmem:[#allocation5 + $0x140] sm:$0xff]  ;;  %v71_v46 = vld [vmem:[#allocation5 + $0xd8] sm:$0xff] }
  0x34   :  { %395 = vmatprep.subr.bf16.mxu1 %v501_v0  ;;  %v85_v44 = vld [vmem:[#allocation5 + $0x148] sm:$0xff]  ;;  %v42_v47 = vld [vmem:[#allocation2 + $0x8] sm:$0xff]  ;;  %v375_v48 = vpack.c.bf16 %v53_v42, %v52_v40  ;;  %v377_v51 = vpack.c.bf16 %v71_v46, %v70_v45  ;;  %v55_v52 = vld [vmem:[#allocation5 + $0x58] sm:$0xff] }
  0x35   :  { %v402_v49 = vpack.c.bf16 %v85_v44, %v84_v43  ;;  %v54_v50 = vld [vmem:[#allocation5 + $0x50] sm:$0xff]  ;;  %v87_v54 = vld [vmem:[#allocation5 + $0x158] sm:$0xff]  ;;  %v72_v55 = vld [vmem:[#allocation5 + $0xe0] sm:$0xff]  ;;  %156 = vmatprep.mubr.f32.mxu0 %v42_v47 }
  0x36   :  { %368 = vmatpush3.bf16.msra.mxu0 %v367_v29  ;;  %v86_v53 = vld [vmem:[#allocation5 + $0x150] sm:$0xff]  ;;  %v73_v56 = vld [vmem:[#allocation5 + $0xe8] sm:$0xff]  ;;  %v379_v57 = vpack.c.bf16 %v55_v52, %v54_v50  ;;  %v56_v59 = vld [vmem:[#allocation5 + $0x60] sm:$0xff] }
  0x37   :  { %397 = vmatpush3.bf16.msra.mxu1 %v396_v30  ;;  %370 = vmatprep.subr.bf16.mxu0 %v369_v32  ;;  %v405_v58 = vpack.c.bf16 %v87_v54, %v86_v53  ;;  %v381_v60 = vpack.c.bf16 %v73_v56, %v72_v55  ;;  %v57_v61 = vld [vmem:[#allocation5 + $0x68] sm:$0xff]  ;;  %v88_v62 = vld [vmem:[#allocation5 + $0x160] sm:$0xff]  ;;  %v74_v1 = vld [vmem:[#allocation5 + $0xf0] sm:$0xff] }
  0x38   :  { %398 = vmatprep.subr.bf16.mxu1 %v501_v0  ;;  %v89_v63 = vld [vmem:[#allocation5 + $0x168] sm:$0xff]  ;;  %v75_v2 = vld [vmem:[#allocation5 + $0xf8] sm:$0xff]  ;;  %v383_v3 = vpack.c.bf16 %v57_v61, %v56_v59  ;;  %v58_v5 = vld [vmem:[#allocation5 + $0x70] sm:$0xff] }
  0x39   :  { %v408_v4 = vpack.c.bf16 %v89_v63, %v88_v62  ;;  %v385_v6 = vpack.c.bf16 %v75_v2, %v74_v1  ;;  %v59_v7 = vld [vmem:[#allocation5 + $0x78] sm:$0xff]  ;;  %v90_v8 = vld [vmem:[#allocation5 + $0x170] sm:$0xff]  ;;  %v41_v12 = vld [vmem:[#allocation2] sm:$0xff] }
  0x3a   :  { %372 = vmatpush3.bf16.msra.mxu0 %v371_v38  ;;  %v91_v9 = vld [vmem:[#allocation5 + $0x178] sm:$0xff]  ;;  %v387_v10 = vpack.c.bf16 %v59_v7, %v58_v5  ;;  %v269_v19 = vld [vmem:[%s584_s2] ss:$0 sm:$0xff]  ;;  %s469_s2 = scalar_lea.vmem %s260_s15, 128 }
  0x3b   :  { %400 = vmatpush3.bf16.msra.mxu1 %v399_v39  ;;  %374 = vmatprep.subr.bf16.mxu0 %v373_v41  ;;  %v411_v11 = vpack.c.bf16 %v91_v9, %v90_v8  ;;  %v43_v13 = vld [vmem:[#allocation2 + $0x10] sm:$0xff]  ;;  %p470_p4 = scmp.ne.s32.totalorder %s260_s15, %s469_s2  ;;  %p475_p6 = scmp.lt.s32.totalorder %s469_s2, %s469_s2 }
  0x3c   :  { %401 = vmatprep.subr.bf16.mxu1 %v501_v0 }
  0x3d   :  { %p476_p7 = por %p475_p6, %p474_p5 }
  0x3e   :  { %376 = vmatpush3.bf16.msra.mxu0 %v375_v48 }
  0x3f   :  { %403 = vmatpush3.bf16.msra.mxu1 %v402_v49  ;;  %378 = vmatprep.subr.bf16.mxu0 %v377_v51  ;;  %p477_p8 = pnand %p476_p7, %p470_p4 }
  0x40   :  { %404 = vmatprep.subr.bf16.mxu1 %v501_v0 }
  0x42   :  { %380 = vmatpush3.bf16.msra.mxu0 %v379_v57 }
  0x43   :  { %406 = vmatpush3.bf16.msra.mxu1 %v405_v58  ;;  %382 = vmatprep.subr.bf16.mxu0 %v381_v60 }
  0x44   :  { %407 = vmatprep.subr.bf16.mxu1 %v501_v0 }
  0x46   :  { %384 = vmatpush3.bf16.msra.mxu0 %v383_v3 }
  0x47   :  { %409 = vmatpush3.bf16.msra.mxu1 %v408_v4  ;;  %386 = vmatprep.subr.bf16.mxu0 %v385_v6 }
  0x48   :  { %410 = vmatprep.subr.bf16.mxu1 %v501_v0 }
  0x4a   :  { %388 = vmatpush3.bf16.msra.mxu0 %v387_v10 }
  0x4b   :  { %412 = vmatpush3.bf16.msra.mxu1 %v411_v11 }
  0x4d   :  { %157 = vmatmul.mubr.f32.vlgmr.msra.gmra.mrb[0].mxu0 %v41_v12 }
  0x4e   :  { %355 = vmatmul.mubr.f32.vlgmr.msra.gmra.mrb[0].mxu1 %v43_v13 }
 0x120   :  { %v302_v14 = vpop.f32.mrb[0].mxu0 }
 0x121   :  { %v228_v15 = vpop.f32.mrb[0].mxu1  ;;  %v303_v16 = vpop.f32.mrb[1].mxu0 }
 0x122   :  { %v356_v17 = vpop.f32.mrb[1].mxu1  ;;  %v304_v18 = vadd.f32 %v303_v16, %v302_v14 }
 0x124   :  { %v229_v20 = vadd.f32 %v304_v18, %v228_v15 }
 0x126   :  { %v239_v21 = vadd.f32 %v269_v19, %v229_v20 }
 0x128   :  { %240 = vmax.xlane.f32.xlu0 %v239_v21 }
 0x1b5   :  { %v241_v22 = vpop.xlane.xlu0 %240 }
 0x1b6   :  { %v242_v0 = vsub.f32 %v239_v21, %v241_v22 }
 0x1b8   :  { %v243_v23 = vmul.f32 1.442695, %v242_v0 }
 0x1ba   :  { %421 = vpow2.f32 %v243_v23 }
 0x1c4   :  { %v422_v24 = vpop.eup %421 }
 0x1c5   :  { %245 = vadd.xlane.f32.xlu0 %v422_v24 }
 0x252   :  { %v246_v25 = vpop.xlane.xlu0 %245 }
 0x253   :  { %423 = vlog2.f32 %v246_v25 }
 0x25d   :  { %v424_v26 = vpop.eup %423 }
 0x25e   :  { %v248_v27 = vmul.f32 0.6931472, %v424_v26 }
 0x260   :  { %v249_v28 = vadd.f32 %v248_v27, %v241_v22 }
 0x262   :  { %v250_v29 = vsub.f32 %v229_v20, %v249_v28 }
 0x264   :  { %252 = vst.msk [vmem:[#allocation7] sm:$0xff] %vm251_vm1, %v250_v29 }
 0x265   :  { %480 = shalt.err (!%p477_p8)
}
 0x266   :  { %s481_s18 = scalar_lea.hbm %s585_s3, 128 }
 0x267   :  { %p482_p9 = scmp.ne.s32.totalorder %s585_s3, %s481_s18  ;;  %p485_p10 = scmp.lt.u32.totalorder %s481_s18, %s585_s3 }
 0x269   :  { %p487_p11 = pnand %p485_p10, %p482_p9 }
 0x26b   :  { %490 = shalt.err (!%p487_p11)
}
 0x26c   :  { %262 = dma.vmem_to_hbm [thread:$0]  %s260_s15, 128, %s585_s3, [#allocation4]  }
 0x26d   :  { %495 = dma.done.wait [#allocation4], 128  }
 0x26e   :  { %496 = vsyncadd [#allocation4], 4294967168 }
 0x26f   :  { %266 = vsyncpa [#allocation3], 1 }
 0x270   :  { %267 = vsyncpa [#allocation6], 1 }
 0x271   :  { %268 = vsyncpa [#allocation4], 1 }

</bundles_post_ra>
